<compile_context>
chip_gen: v7x
topology: tpu7x:2x2x1
jax: 0.10.0
libtpu: 0.0.40
codegen_flags: <defaults>
</compile_context>

<pallas_src>
import functools

import jax
import jax.numpy as jnp
from jax.experimental import pallas as pl
from jax.experimental.pallas import tpu as pltpu


def _round_up(x: int, m: int) -> int:
    return (x + m - 1) // m * m


def _vmem_limit_bytes() -> int:
    """Per-generation VMEM budget: ~3/4 of physical VMEM, capped at 96 MiB.
    v7x (64 MiB) -> 48 MiB; v5e/v6e (128 MiB) -> 96 MiB. Conservative fallback."""
    try:
        cap = int(pltpu.get_tpu_info().vmem_capacity_bytes)
    except Exception:
        cap = 64 * 1024 * 1024
    return int(min(cap * 3 // 4, 96 * 1024 * 1024))


# --------------------------------------------------------------------------
# Kernels. Grid = (dest tile i, relation r, source tile k). r and k are the
# reduction axes (innermost, "arbitrary"); the output block depends only on i,
# so it stays resident in VMEM and accumulates the mean over relations.
# --------------------------------------------------------------------------
def _rgcn_kernel_xw(adj_ref, xs_ref, w_ref, s_dst_ref, b_ref, o_ref, ax_ref,
                    *, apply_relu: bool, xs_resident: bool):
    """Association (A_r XS_r) W_r — used when F_in <= F_out.
    adj/xs are bf16 (binary adjacency is exact in bf16), MXU accumulates f32;
    the small feature-transform matmul stays f32."""
    r, k = pl.program_id(1), pl.program_id(2)
    last_r = pl.num_programs(1) - 1
    last_k = pl.num_programs(2) - 1

    @pl.when(jnp.logical_and(r == 0, k == 0))
    def _():
        o_ref[...] = jnp.zeros_like(o_ref)

    @pl.when(k == 0)
    def _():
        ax_ref[...] = jnp.zeros_like(ax_ref)

    xs = xs_ref[r, k] if xs_resident else xs_ref[...]        # (t_src, f_in) bf16
    ax_ref[...] += jnp.dot(adj_ref[...], xs,                 # bf16 x bf16 -> f32
                           preferred_element_type=jnp.float32)

    @pl.when(k == last_k)
    def _():
        h = jnp.dot(ax_ref[...], w_ref[...],                 # small f32 matmul
                    preferred_element_type=jnp.float32)
        o_ref[...] += h * s_dst_ref[...]                     # s_dst folds 1/R

    @pl.when(jnp.logical_and(r == last_r, k == last_k))
    def _():
        out = o_ref[...] + b_ref[...]                        # hoisted mean bias
        if apply_relu:
            out = jnp.maximum(out, 0.0)
        o_ref[...] = out


def _rgcn_kernel_pre(adj_ref, y_ref, s_dst_ref, b_ref, o_ref,
                     *, apply_relu: bool, y_resident: bool):
    """Association A_r (diag(s_src_r) X W_r) — used when F_out < F_in.
    Y_r is precomputed (bf16) in the wrapper; the N^2 matmul has width F_out."""
    r, k = pl.program_id(1), pl.program_id(2)
    last_r = pl.num_programs(1) - 1
    last_k = pl.num_programs(2) - 1

    @pl.when(jnp.logical_and(r == 0, k == 0))
    def _():
        o_ref[...] = jnp.zeros_like(o_ref)

    y = y_ref[r, k] if y_resident else y_ref[...]            # (t_src, f_out) bf16
    h = jnp.dot(adj_ref[...], y, preferred_element_type=jnp.float32)
    o_ref[...] += h * s_dst_ref[...]                         # s_dst folds 1/R

    @pl.when(jnp.logical_and(r == last_r, k == last_k))
    def _():
        out = o_ref[...] + b_ref[...]
        if apply_relu:
            out = jnp.maximum(out, 0.0)
        # NOTE: padded dest rows get relu(b_mean) here; they are sliced off.
        o_ref[...] = out


# --------------------------------------------------------------------------
# Layer wrapper
# --------------------------------------------------------------------------
def rgcn_layer(adj_p, s_dst_p, s_src, x, w, b, *, tiling, apply_relu,
               z_resident_budget=None):
    """One RGCN layer (HeteroGraphConv of GraphConv, aggregate='mean').

    adj_p:   (R, n_dst_pad, n_src_pad) bf16 padded binary adjacency
             (adj[r, d, s] = 1 iff edge s->d), padded ONCE in rgcn_forward.
    s_dst_p: (R, n_dst_pad, 1) f32 = clamped 1/sqrt(in-degree) / R (1/R folded).
    s_src:   (R, N) f32 = clamped 1/sqrt(out-degree), unpadded.
    x: (N, F_in) f32; w: (R, F_in, F_out); b: (R, F_out).
    """
    t_dst, t_src, n_dst_pad, n_src_pad = tiling
    R = adj_p.shape[0]
    N = x.shape[0]
    F_in, F_out = int(w.shape[1]), int(w.shape[2])
    f_in_pad = _round_up(F_in, 128)
    f_out_pad = _round_up(F_out, 128)
    n_i = n_dst_pad // t_dst
    n_k = n_src_pad // t_src

    vmem_limit = _vmem_limit_bytes()
    if z_resident_budget is None:
        # Resident block may be double-buffered by the pipeliner; budget 2x and
        # keep >= half the limit free for adjacency tiles / output / scratch.
        z_resident_budget = vmem_limit // 4

    x32 = x.astype(jnp.float32)
    w32 = w.astype(jnp.float32)
    s_src32 = s_src.astype(jnp.float32)

    # Bias hoist: mean_r (h_r + b_r) == mean_r h_r + mean_r b_r.
    b_mean = jnp.pad(jnp.mean(b.astype(jnp.float32), axis=0),
                     (0, f_out_pad - F_out)).reshape(1, f_out_pad)

    # Matmul association per layer: keep the N^2 term at width min(F_in, F_out).
    pre_transformed = F_out < F_in
    if pre_transformed:
        # Y_r = diag(s_src_r) X W_r  (small O(R*N*F_in*F_out) matmul in f32).
        z = jnp.einsum("rn,nf,rfo->rno", s_src32, x32, w32)
        f_z = f_out_pad
    else:
        # XS_r = diag(s_src_r) X; W_r multiplied in-kernel (f32).
        z = s_src32[:, :, None] * x32[None]
        f_z = f_in_pad
    # Stream in bf16 (halves HBM bytes of the non-adjacency operand).
    z = jnp.pad(z.astype(jnp.bfloat16),
                ((0, 0), (0, n_src_pad - N), (0, f_z - z.shape[2])))
    z = z.reshape(R, n_k, t_src, f_z)

    z_resident = (2 * z.size * 2) <= z_resident_budget
    if z_resident:
        # Constant-index full block: DMA'd exactly once; indexed by (r, k) in-kernel.
        z_spec = pl.BlockSpec((R, n_k, t_src, f_z), lambda i, r, k: (0, 0, 0, 0))
    else:
        z_spec = pl.BlockSpec((pl.Squeezed(), pl.Squeezed(), t_src, f_z),
                              lambda i, r, k: (r, k, 0, 0))

    adj_spec = pl.BlockSpec((pl.Squeezed(), t_dst, t_src), lambda i, r, k: (r, i, k))
    s_dst_spec = pl.BlockSpec((pl.Squeezed(), t_dst, 1), lambda i, r, k: (r, i, 0))
    b_spec = pl.BlockSpec((1, f_out_pad), lambda i, r, k: (0, 0))
    out_spec = pl.BlockSpec((t_dst, f_out_pad), lambda i, r, k: (i, 0))

    if pre_transformed:
        kernel = functools.partial(_rgcn_kernel_pre, apply_relu=apply_relu,
                                   y_resident=z_resident)
        in_specs = [adj_spec, z_spec, s_dst_spec, b_spec]
        args = (adj_p, z, s_dst_p, b_mean)
        scratch = []
    else:
        w_p = jnp.pad(w32, ((0, 0), (0, f_in_pad - F_in), (0, f_out_pad - F_out)))
        w_spec = pl.BlockSpec((pl.Squeezed(), f_in_pad, f_out_pad),
                              lambda i, r, k: (r, 0, 0))
        kernel = functools.partial(_rgcn_kernel_xw, apply_relu=apply_relu,
                                   xs_resident=z_resident)
        in_specs = [adj_spec, z_spec, w_spec, s_dst_spec, b_spec]
        args = (adj_p, z, w_p, s_dst_p, b_mean)
        scratch = [pltpu.VMEM((t_dst, f_in_pad), jnp.float32)]   # per-relation A@XS

    out = pl.pallas_call(
        kernel,
        out_shape=jax.ShapeDtypeStruct((n_dst_pad, f_out_pad), jnp.float32),
        grid_spec=pltpu.PrefetchScalarGridSpec(
            num_scalar_prefetch=0,
            grid=(n_i, R, n_k),
            in_specs=in_specs,
            out_specs=out_spec,
            scratch_shapes=scratch),
        compiler_params=pltpu.CompilerParams(
            dimension_semantics=("parallel", "arbitrary", "arbitrary"),
            vmem_limit_bytes=vmem_limit),
    )(*args)
    return out[:N, :F_out]


# --------------------------------------------------------------------------
# Full forward + reference
# --------------------------------------------------------------------------
def degree_scales(adj):
    """DGL GraphConv norm='both': clamped 1/sqrt(degree) vectors, per relation."""
    deg_src = jnp.sum(adj, axis=1)                    # out-degree of source nodes
    deg_dst = jnp.sum(adj, axis=2)                    # in-degree of destination nodes
    s_src = 1.0 / jnp.sqrt(jnp.clip(deg_src, 1.0))
    s_dst = 1.0 / jnp.sqrt(jnp.clip(deg_dst, 1.0))
    return s_src, s_dst


def _node_tiling(n):
    """Dest/source node tiling shared by both layers.
    t_dst gives >=2 dest tiles for N > 128 (v7x megacore split) and caps at 512;
    t_src bounds per-step VMEM independent of graph size (source/K tiling)."""
    t_dst = min(512, _round_up(-(-n // 2), 128))
    t_src = min(512, _round_up(n, 128))
    return t_dst, t_src, _round_up(n, t_dst), _round_up(n, t_src)


def rgcn_forward(adj, x, params, *, z_resident_budget=None):
    """Two-layer RGCN forward: conv1 -> ReLU -> conv2 (mean over relations)."""
    R, N, _ = adj.shape
    s_src, s_dst = degree_scales(adj)
    tiling = _node_tiling(N)
    t_dst, t_src, n_dst_pad, n_src_pad = tiling

    # Pad + bf16-cast the binary adjacency ONCE (exact in bf16); shared by layers.
    adj_p = jnp.pad(adj.astype(jnp.bfloat16),
                    ((0, 0), (0, n_dst_pad - N), (0, n_src_pad - N)))
    # Fold the 1/R of the 'mean' aggregate into the dst scaling; pad once.
    s_dst_p = jnp.pad((s_dst / R).astype(jnp.float32),
                      ((0, 0), (0, n_dst_pad - N))).reshape(R, n_dst_pad, 1)

    h = rgcn_layer(adj_p, s_dst_p, s_src, x, params["w1"], params["b1"],
                   tiling=tiling, apply_relu=True,
                   z_resident_budget=z_resident_budget)
    h = rgcn_layer(adj_p, s_dst_p, s_src, h, params["w2"], params["b2"],
                   tiling=tiling, apply_relu=False,
                   z_resident_budget=z_resident_budget)
    return h


def rgcn_reference(adj, x, params):
    """Pure-JAX reference (materialized normalized adjacency)."""
    s_src, s_dst = degree_scales(adj)
    adj_n = adj * s_dst[:, :, None] * s_src[:, None, :]
    h1 = jnp.einsum("rds,sf,rfo->rdo", adj_n, x, params["w1"]) + params["b1"][:, None, :]
    h = jax.nn.relu(jnp.mean(h1, axis=0))
    h2 = jnp.einsum("rds,sf,rfo->rdo", adj_n, h, params["w2"]) + params["b2"][:, None, :]
    return jnp.mean(h2, axis=0)


def init_params(key, in_feats, hid_feats, out_feats, n_rel):
    """Glorot-style weights; bias randomized (DGL defaults to zero) so the
    hoisted-bias path is exercised."""
    k1, k2, k3, k4 = jax.random.split(key, 4)
    s1 = jnp.sqrt(6.0 / (in_feats + hid_feats))
    s2 = jnp.sqrt(6.0 / (hid_feats + out_feats))
    return {
        "w1": jax.random.uniform(k1, (n_rel, in_feats, hid_feats),
                                 jnp.float32, -s1, s1),
        "b1": 0.1 * jax.random.normal(k3, (n_rel, hid_feats), jnp.float32),
        "w2": jax.random.uniform(k2, (n_rel, hid_feats, out_feats),
                                 jnp.float32, -s2, s2),
        "b2": 0.1 * jax.random.normal(k4, (n_rel, out_feats), jnp.float32),
    }


if __name__ == "__main__":
    # 3 relations, one shared node type, in=8, hid=32, out=16.
    # Layer 1 (F_in<=F_out) exercises the (A XS) W kernel; layer 2 (F_out<F_in)
    # exercises the pre-transformed A Y kernel.
    N_REL = 3
    IN_FEATS, HID_FEATS, OUT_FEATS = 8, 32, 16

    key = jax.random.PRNGKey(0)
    k_small, k_med = jax.random.split(key)

    def make_problem(k, n_nodes):
        k_adj, k_x, k_p = jax.random.split(k, 3)
        adj = (jax.random.uniform(k_adj, (N_REL, n_nodes, n_nodes)) < 0.3
               ).astype(jnp.float32)
        x = jax.random.normal(k_x, (n_nodes, IN_FEATS), jnp.float32)
        params = init_params(k_p, IN_FEATS, HID_FEATS, OUT_FEATS, N_REL)
        return adj, x, params

    fwd = jax.jit(rgcn_forward, static_argnames=("z_resident_budget",))

    # Small problem: single dest/src tile, VMEM-resident feature matrix path.
    adj, x, params = make_problem(k_small, 16)
    out = jax.block_until_ready(fwd(adj, x, params))
    ref = rgcn_reference(adj, x, params)
    assert out.shape == (16, OUT_FEATS), out.shape
    err = float(jnp.max(jnp.abs(out - ref)))
    assert jnp.allclose(out, ref, atol=2e-2, rtol=2e-2), err

    # Medium problem with the streamed (non-resident) path forced: exercises
    # multiple dest tiles, multiple source (K) tiles and per-(r, k) Z blocks.
    adj2, x2, params2 = make_problem(k_med, 600)
    out2 = jax.block_until_ready(fwd(adj2, x2, params2, z_resident_budget=0))
    ref2 = rgcn_reference(adj2, x2, params2)
    err2 = float(jnp.max(jnp.abs(out2 - ref2)))
    assert jnp.allclose(out2, ref2, atol=2e-2, rtol=2e-2), err2

    print("KERNEL_OK")
</pallas_src>

<mosaic_0001>
module attributes {stable_mosaic.version = 11 : i64} {
  func.func @_rgcn_kernel_xw(%arg0: i32, %arg1: i32, %arg2: i32, %arg3: memref<1x128x128xbf16, #tpu.memory_space<vmem>>, %arg4: memref<3x1x128x128xbf16, #tpu.memory_space<vmem>>, %arg5: memref<1x128x128xf32, #tpu.memory_space<vmem>>, %arg6: memref<1x128x1xf32, #tpu.memory_space<vmem>>, %arg7: memref<1x128xf32, #tpu.memory_space<vmem>>, %arg8: memref<128x128xf32, #tpu.memory_space<vmem>>, %arg9: memref<128x128xf32, #tpu.memory_space<vmem>>) attributes {dimension_semantics = [#tpu.dimension_semantics<parallel>, #tpu.dimension_semantics<arbitrary>, #tpu.dimension_semantics<arbitrary>], iteration_bounds = array<i64: 1, 3, 1>, scalar_prefetch = 0 : i64, scratch_operands = 1 : i64, tpu.core_type = #tpu.core_type<tc>, window_params = [{transform_indices = @transform_0, window_bounds = array<i64: 1, 128, 128>}, {pipeline_mode = #tpu.pipeline_mode<synchronous>, transform_indices = @transform_1, window_bounds = array<i64: 3, 1, 128, 128>}, {transform_indices = @transform_2, window_bounds = array<i64: 1, 128, 128>}, {transform_indices = @transform_3, window_bounds = array<i64: 1, 128, 1>}, {pipeline_mode = #tpu.pipeline_mode<synchronous>, transform_indices = @transform_4, window_bounds = array<i64: 1, 128>}, {transform_indices = @transform_5, window_bounds = array<i64: 128, 128>}]} {
    %c0_i32 = arith.constant 0 : i32
    %0 = arith.cmpi eq, %arg1, %c0_i32 : i32
    %c0_i32_0 = arith.constant 0 : i32
    %1 = arith.cmpi eq, %arg2, %c0_i32_0 : i32
    %2 = arith.andi %0, %1 : i1
    %3 = arith.extui %2 : i1 to i32
    %c0_i32_1 = arith.constant 0 : i32
    %4 = arith.cmpi ne, %3, %c0_i32_1 : i32
    scf.if %4 {
      %cst_16 = arith.constant 0.000000e+00 : f32
      %26 = vector.broadcast %cst_16 : f32 to vector<128x128xf32>
      %c0_17 = arith.constant 0 : index
      %c0_18 = arith.constant 0 : index
      %27 = vector.load %arg8[%c0_17, %c0_18] : memref<128x128xf32, #tpu.memory_space<vmem>>, vector<128x128xf32>
      tpu.vector_store %arg8[%c0_17, %c0_18], %26 {strides = array<i32>} : memref<128x128xf32, #tpu.memory_space<vmem>>, vector<128x128xf32>,
    } else {
    }
    %c0_i32_2 = arith.constant 0 : i32
    %5 = arith.cmpi eq, %arg2, %c0_i32_2 : i32
    %6 = arith.extui %5 : i1 to i32
    %c0_i32_3 = arith.constant 0 : i32
    %7 = arith.cmpi ne, %6, %c0_i32_3 : i32
    scf.if %7 {
      %cst_16 = arith.constant 0.000000e+00 : f32
      %26 = vector.broadcast %cst_16 : f32 to vector<128x128xf32>
      %c0_17 = arith.constant 0 : index
      %c0_18 = arith.constant 0 : index
      %27 = vector.load %arg9[%c0_17, %c0_18] : memref<128x128xf32, #tpu.memory_space<vmem>>, vector<128x128xf32>
      tpu.vector_store %arg9[%c0_17, %c0_18], %26 {strides = array<i32>} : memref<128x128xf32, #tpu.memory_space<vmem>>, vector<128x128xf32>,
    } else {
    }
    %8 = arith.index_cast %arg1 : i32 to index
    %9 = arith.index_cast %arg2 : i32 to index
    %c0 = arith.constant 0 : index
    %c0_4 = arith.constant 0 : index
    %10 = vector.load %arg4[%8, %9, %c0, %c0_4] : memref<3x1x128x128xbf16, #tpu.memory_space<vmem>>, vector<1x1x128x128xbf16>
    %11 = vector.shape_cast %10 : vector<1x1x128x128xbf16> to vector<128x128xbf16>
    %c0_5 = arith.constant 0 : index
    %c0_6 = arith.constant 0 : index
    %12 = vector.load %arg9[%c0_5, %c0_6] : memref<128x128xf32, #tpu.memory_space<vmem>>, vector<128x128xf32>
    %c0_7 = arith.constant 0 : index
    %c0_8 = arith.constant 0 : index
    %c0_9 = arith.constant 0 : index
    %13 = vector.load %arg3[%c0_7, %c0_8, %c0_9] : memref<1x128x128xbf16, #tpu.memory_space<vmem>>, vector<1x128x128xbf16>
    %14 = vector.shape_cast %13 : vector<1x128x128xbf16> to vector<128x128xbf16>
    %cst = arith.constant dense<0.000000e+00> : vector<128x128xf32>
    %15 = tpu.matmul %14, %11, %cst {dimension_numbers = #tpu.dot_dimension_numbers<[1], [0], [0], [1], [0, 0, 1, 1], [], []>} : vector<128x128xbf16>, vector<128x128xbf16>, vector<128x128xf32> -> vector<128x128xf32>
    %16 = arith.addf %12, %15 : vector<128x128xf32>
    %c0_10 = arith.constant 0 : index
    %c0_11 = arith.constant 0 : index
    %17 = vector.load %arg9[%c0_10, %c0_11] : memref<128x128xf32, #tpu.memory_space<vmem>>, vector<128x128xf32>
    tpu.vector_store %arg9[%c0_10, %c0_11], %16 {strides = array<i32>} : memref<128x128xf32, #tpu.memory_space<vmem>>, vector<128x128xf32>,
    %c0_i32_12 = arith.constant 0 : i32
    %18 = arith.cmpi eq, %arg2, %c0_i32_12 : i32
    %19 = arith.extui %18 : i1 to i32
    %c0_i32_13 = arith.constant 0 : i32
    %20 = arith.cmpi ne, %19, %c0_i32_13 : i32
    scf.if %20 {
      %c0_16 = arith.constant 0 : index
      %c0_17 = arith.constant 0 : index
      %26 = vector.load %arg9[%c0_16, %c0_17] : memref<128x128xf32, #tpu.memory_space<vmem>>, vector<128x128xf32>
      %c0_18 = arith.constant 0 : index
      %c0_19 = arith.constant 0 : index
      %c0_20 = arith.constant 0 : index
      %27 = vector.load %arg5[%c0_18, %c0_19, %c0_20] : memref<1x128x128xf32, #tpu.memory_space<vmem>>, vector<1x128x128xf32>
      %28 = vector.shape_cast %27 : vector<1x128x128xf32> to vector<128x128xf32>
      %cst_21 = arith.constant dense<0.000000e+00> : vector<128x128xf32>
      %29 = tpu.matmul %26, %28, %cst_21 {dimension_numbers = #tpu.dot_dimension_numbers<[1], [0], [0], [1], [0, 0, 1, 1], [], []>} : vector<128x128xf32>, vector<128x128xf32>, vector<128x128xf32> -> vector<128x128xf32>
      %c0_22 = arith.constant 0 : index
      %c0_23 = arith.constant 0 : index
      %30 = vector.load %arg8[%c0_22, %c0_23] : memref<128x128xf32, #tpu.memory_space<vmem>>, vector<128x128xf32>
      %c0_24 = arith.constant 0 : index
      %c0_25 = arith.constant 0 : index
      %c0_26 = arith.constant 0 : index
      %31 = vector.load %arg6[%c0_24, %c0_25, %c0_26] : memref<1x128x1xf32, #tpu.memory_space<vmem>>, vector<1x128x1xf32>
      %32 = vector.shape_cast %31 : vector<1x128x1xf32> to vector<128x1xf32>
      %33 = vector.broadcast %32 : vector<128x1xf32> to vector<128x128xf32>
      %34 = arith.mulf %29, %33 : vector<128x128xf32>
      %35 = arith.addf %30, %34 : vector<128x128xf32>
      %c0_27 = arith.constant 0 : index
      %c0_28 = arith.constant 0 : index
      %36 = vector.load %arg8[%c0_27, %c0_28] : memref<128x128xf32, #tpu.memory_space<vmem>>, vector<128x128xf32>
      tpu.vector_store %arg8[%c0_27, %c0_28], %35 {strides = array<i32>} : memref<128x128xf32, #tpu.memory_space<vmem>>, vector<128x128xf32>,
    } else {
    }
    %c2_i32 = arith.constant 2 : i32
    %21 = arith.cmpi eq, %arg1, %c2_i32 : i32
    %c0_i32_14 = arith.constant 0 : i32
    %22 = arith.cmpi eq, %arg2, %c0_i32_14 : i32
    %23 = arith.andi %21, %22 : i1
    %24 = arith.extui %23 : i1 to i32
    %c0_i32_15 = arith.constant 0 : i32
    %25 = arith.cmpi ne, %24, %c0_i32_15 : i32
    scf.if %25 {
      %c0_16 = arith.constant 0 : index
      %c0_17 = arith.constant 0 : index
      %26 = vector.load %arg8[%c0_16, %c0_17] : memref<128x128xf32, #tpu.memory_space<vmem>>, vector<128x128xf32>
      %c0_18 = arith.constant 0 : index
      %c0_19 = arith.constant 0 : index
      %27 = vector.load %arg7[%c0_18, %c0_19] : memref<1x128xf32, #tpu.memory_space<vmem>>, vector<1x128xf32>
      %28 = vector.broadcast %27 : vector<1x128xf32> to vector<128x128xf32>
      %29 = arith.addf %26, %28 : vector<128x128xf32>
      %cst_20 = arith.constant 0.000000e+00 : f32
      %30 = vector.broadcast %cst_20 : f32 to vector<128x128xf32>
      %31 = arith.maximumf %29, %30 : vector<128x128xf32>
      %c0_21 = arith.constant 0 : index
      %c0_22 = arith.constant 0 : index
      %32 = vector.load %arg8[%c0_21, %c0_22] : memref<128x128xf32, #tpu.memory_space<vmem>>, vector<128x128xf32>
      tpu.vector_store %arg8[%c0_21, %c0_22], %31 {strides = array<i32>} : memref<128x128xf32, #tpu.memory_space<vmem>>, vector<128x128xf32>,
    } else {
    }
    return
  }
  func.func @transform_0(%arg0: i32, %arg1: i32, %arg2: i32) -> (i32, i32, i32) {
    %c0_i32 = arith.constant 0 : i32
    return %arg1, %arg0, %arg2 : i32, i32, i32
  }
  func.func @transform_1(%arg0: i32, %arg1: i32, %arg2: i32) -> (i32, i32, i32, i32) {
    %c0_i32 = arith.constant 0 : i32
    %c0_i32_0 = arith.constant 0 : i32
    %c0_i32_1 = arith.constant 0 : i32
    %c0_i32_2 = arith.constant 0 : i32
    %c0_i32_3 = arith.constant 0 : i32
    return %c0_i32, %c0_i32_0, %c0_i32_1, %c0_i32_2 : i32, i32, i32, i32
  }
  func.func @transform_2(%arg0: i32, %arg1: i32, %arg2: i32) -> (i32, i32, i32) {
    %c0_i32 = arith.constant 0 : i32
    %c0_i32_0 = arith.constant 0 : i32
    %c0_i32_1 = arith.constant 0 : i32
    return %arg1, %c0_i32, %c0_i32_0 : i32, i32, i32
  }
  func.func @transform_3(%arg0: i32, %arg1: i32, %arg2: i32) -> (i32, i32, i32) {
    %c0_i32 = arith.constant 0 : i32
    %c0_i32_0 = arith.constant 0 : i32
    return %arg1, %arg0, %c0_i32 : i32, i32, i32
  }
  func.func @transform_4(%arg0: i32, %arg1: i32, %arg2: i32) -> (i32, i32) {
    %c0_i32 = arith.constant 0 : i32
    %c0_i32_0 = arith.constant 0 : i32
    %c0_i32_1 = arith.constant 0 : i32
    return %c0_i32, %c0_i32_0 : i32, i32
  }
  func.func @transform_5(%arg0: i32, %arg1: i32, %arg2: i32) -> (i32, i32) {
    %c0_i32 = arith.constant 0 : i32
    %c0_i32_0 = arith.constant 0 : i32
    return %arg0, %c0_i32 : i32, i32
  }
}

module attributes {stable_mosaic.version = 11 : i64} {
  func.func @_rgcn_kernel_pre(%arg0: i32, %arg1: i32, %arg2: i32, %arg3: memref<1x128x128xbf16, #tpu.memory_space<vmem>>, %arg4: memref<3x1x128x128xbf16, #tpu.memory_space<vmem>>, %arg5: memref<1x128x1xf32, #tpu.memory_space<vmem>>, %arg6: memref<1x128xf32, #tpu.memory_space<vmem>>, %arg7: memref<128x128xf32, #tpu.memory_space<vmem>>) attributes {dimension_semantics = [#tpu.dimension_semantics<parallel>, #tpu.dimension_semantics<arbitrary>, #tpu.dimension_semantics<arbitrary>], iteration_bounds = array<i64: 1, 3, 1>, scalar_prefetch = 0 : i64, scratch_operands = 0 : i64, tpu.core_type = #tpu.core_type<tc>, window_params = [{transform_indices = @transform_0, window_bounds = array<i64: 1, 128, 128>}, {pipeline_mode = #tpu.pipeline_mode<synchronous>, transform_indices = @transform_1, window_bounds = array<i64: 3, 1, 128, 128>}, {transform_indices = @transform_2, window_bounds = array<i64: 1, 128, 1>}, {pipeline_mode = #tpu.pipeline_mode<synchronous>, transform_indices = @transform_3, window_bounds = array<i64: 1, 128>}, {transform_indices = @transform_4, window_bounds = array<i64: 128, 128>}]} {
    %c0_i32 = arith.constant 0 : i32
    %0 = arith.cmpi eq, %arg1, %c0_i32 : i32
    %c0_i32_0 = arith.constant 0 : i32
    %1 = arith.cmpi eq, %arg2, %c0_i32_0 : i32
    %2 = arith.andi %0, %1 : i1
    %3 = arith.extui %2 : i1 to i32
    %c0_i32_1 = arith.constant 0 : i32
    %4 = arith.cmpi ne, %3, %c0_i32_1 : i32
    scf.if %4 {
      %cst_15 = arith.constant 0.000000e+00 : f32
      %24 = vector.broadcast %cst_15 : f32 to vector<128x128xf32>
      %c0_16 = arith.constant 0 : index
      %c0_17 = arith.constant 0 : index
      %25 = vector.load %arg7[%c0_16, %c0_17] : memref<128x128xf32, #tpu.memory_space<vmem>>, vector<128x128xf32>
      tpu.vector_store %arg7[%c0_16, %c0_17], %24 {strides = array<i32>} : memref<128x128xf32, #tpu.memory_space<vmem>>, vector<128x128xf32>,
    } else {
    }
    %5 = arith.index_cast %arg1 : i32 to index
    %6 = arith.index_cast %arg2 : i32 to index
    %c0 = arith.constant 0 : index
    %c0_2 = arith.constant 0 : index
    %7 = vector.load %arg4[%5, %6, %c0, %c0_2] : memref<3x1x128x128xbf16, #tpu.memory_space<vmem>>, vector<1x1x128x128xbf16>
    %8 = vector.shape_cast %7 : vector<1x1x128x128xbf16> to vector<128x128xbf16>
    %c0_3 = arith.constant 0 : index
    %c0_4 = arith.constant 0 : index
    %c0_5 = arith.constant 0 : index
    %9 = vector.load %arg3[%c0_3, %c0_4, %c0_5] : memref<1x128x128xbf16, #tpu.memory_space<vmem>>, vector<1x128x128xbf16>
    %10 = vector.shape_cast %9 : vector<1x128x128xbf16> to vector<128x128xbf16>
    %cst = arith.constant dense<0.000000e+00> : vector<128x128xf32>
    %11 = tpu.matmul %10, %8, %cst {dimension_numbers = #tpu.dot_dimension_numbers<[1], [0], [0], [1], [0, 0, 1, 1], [], []>} : vector<128x128xbf16>, vector<128x128xbf16>, vector<128x128xf32> -> vector<128x128xf32>
    %c0_6 = arith.constant 0 : index
    %c0_7 = arith.constant 0 : index
    %12 = vector.load %arg7[%c0_6, %c0_7] : memref<128x128xf32, #tpu.memory_space<vmem>>, vector<128x128xf32>
    %c0_8 = arith.constant 0 : index
    %c0_9 = arith.constant 0 : index
    %c0_10 = arith.constant 0 : index
    %13 = vector.load %arg5[%c0_8, %c0_9, %c0_10] : memref<1x128x1xf32, #tpu.memory_space<vmem>>, vector<1x128x1xf32>
    %14 = vector.shape_cast %13 : vector<1x128x1xf32> to vector<128x1xf32>
    %15 = vector.broadcast %14 : vector<128x1xf32> to vector<128x128xf32>
    %16 = arith.mulf %11, %15 : vector<128x128xf32>
    %17 = arith.addf %12, %16 : vector<128x128xf32>
    %c0_11 = arith.constant 0 : index
    %c0_12 = arith.constant 0 : index
    %18 = vector.load %arg7[%c0_11, %c0_12] : memref<128x128xf32, #tpu.memory_space<vmem>>, vector<128x128xf32>
    tpu.vector_store %arg7[%c0_11, %c0_12], %17 {strides = array<i32>} : memref<128x128xf32, #tpu.memory_space<vmem>>, vector<128x128xf32>,
    %c2_i32 = arith.constant 2 : i32
    %19 = arith.cmpi eq, %arg1, %c2_i32 : i32
    %c0_i32_13 = arith.constant 0 : i32
    %20 = arith.cmpi eq, %arg2, %c0_i32_13 : i32
    %21 = arith.andi %19, %20 : i1
    %22 = arith.extui %21 : i1 to i32
    %c0_i32_14 = arith.constant 0 : i32
    %23 = arith.cmpi ne, %22, %c0_i32_14 : i32
    scf.if %23 {
      %c0_15 = arith.constant 0 : index
      %c0_16 = arith.constant 0 : index
      %24 = vector.load %arg7[%c0_15, %c0_16] : memref<128x128xf32, #tpu.memory_space<vmem>>, vector<128x128xf32>
      %c0_17 = arith.constant 0 : index
      %c0_18 = arith.constant 0 : index
      %25 = vector.load %arg6[%c0_17, %c0_18] : memref<1x128xf32, #tpu.memory_space<vmem>>, vector<1x128xf32>
      %26 = vector.broadcast %25 : vector<1x128xf32> to vector<128x128xf32>
      %27 = arith.addf %24, %26 : vector<128x128xf32>
      %c0_19 = arith.constant 0 : index
      %c0_20 = arith.constant 0 : index
      %28 = vector.load %arg7[%c0_19, %c0_20] : memref<128x128xf32, #tpu.memory_space<vmem>>, vector<128x128xf32>
      tpu.vector_store %arg7[%c0_19, %c0_20], %27 {strides = array<i32>} : memref<128x128xf32, #tpu.memory_space<vmem>>, vector<128x128xf32>,
    } else {
    }
    return
  }
  func.func @transform_0(%arg0: i32, %arg1: i32, %arg2: i32) -> (i32, i32, i32) {
    %c0_i32 = arith.constant 0 : i32
    return %arg1, %arg0, %arg2 : i32, i32, i32
  }
  func.func @transform_1(%arg0: i32, %arg1: i32, %arg2: i32) -> (i32, i32, i32, i32) {
    %c0_i32 = arith.constant 0 : i32
    %c0_i32_0 = arith.constant 0 : i32
    %c0_i32_1 = arith.constant 0 : i32
    %c0_i32_2 = arith.constant 0 : i32
    %c0_i32_3 = arith.constant 0 : i32
    return %c0_i32, %c0_i32_0, %c0_i32_1, %c0_i32_2 : i32, i32, i32, i32
  }
  func.func @transform_2(%arg0: i32, %arg1: i32, %arg2: i32) -> (i32, i32, i32) {
    %c0_i32 = arith.constant 0 : i32
    %c0_i32_0 = arith.constant 0 : i32
    return %arg1, %arg0, %c0_i32 : i32, i32, i32
  }
  func.func @transform_3(%arg0: i32, %arg1: i32, %arg2: i32) -> (i32, i32) {
    %c0_i32 = arith.constant 0 : i32
    %c0_i32_0 = arith.constant 0 : i32
    %c0_i32_1 = arith.constant 0 : i32
    return %c0_i32, %c0_i32_0 : i32, i32
  }
  func.func @transform_4(%arg0: i32, %arg1: i32, %arg2: i32) -> (i32, i32) {
    %c0_i32 = arith.constant 0 : i32
    %c0_i32_0 = arith.constant 0 : i32
    return %arg0, %c0_i32 : i32, i32
  }
}

</mosaic_0001>

<bundles_post_ra>
// kernel: rgcn_forward.3
= control target key start
LH: loop header
LB: loop body
LE: loop exit
PB: predicated region body
PF: predicated region fallthrough
CT: control target
= control target key end

     0   :  { %s1048_s15 = smov 0   ;;  %s1050_s16 = smov 0   ;;  %s1383_s0 = inlined_call_operand.vmem [shape: bf16[3,128,128], index: 0, kind: input, shape index: {}]   ;;  %s1384_s1 = inlined_call_operand.vmem [shape: bf16[3,1,128,128], index: 1, kind: input, shape index: {}]   ;;  %s1385_s2 = inlined_call_operand.vmem [shape: f32[3,128,1], index: 2, kind: input, shape index: {}]   ;;  %s1386_s3 = inlined_call_operand.vmem [shape: f32[1,128], index: 3, kind: input, shape index: {}]   ;;  %s1387_s4 = inlined_call_operand.vmem [shape: f32[128,128], index: 4, kind: output, shape index: {}]  }
   0x1   :  { %s1052_s17 = smov 0  }
   0x2 LB: > { %s29_s18 = sadd.s32 1, %s1015_s16  ;;  %p854_p0 = scmp.ge.s32.totalorder %s1019_s17, 1  ;;  %s1019_s17 = sphi %s1052_s17, %s14_s17   ;;  %s1015_s16 = sphi %s1050_s16, %s1389_s16   ;;  %s1011_s15 = sphi %s1048_s15, %s1388_s15  }
   0x3   : > { %p31_p1 = scmp.ge.s32.totalorder %s29_s18, 3  ;;  %p210_p2 = scmp.lt.s32.totalorder %s1019_s17, 4 }
   0x5   : > { %s1391_s18 = smov (%p31_p1, %s29_s18), 0  ;;  %p211_p3 = pnand %p854_p0, %p210_p2 }
   0x6   : > { %p253_p4 = scmp.lt.s32.totalorder (!%p211_p3), %s1011_s15, 2  ;;  %p282_p5 = scmp.eq.s32.totalorder (!%p211_p3), %s1011_s15, 0 }
   0x7   : > { %214 = sbr.rel (%p211_p3) target bundleno = 298 (0x12a), region = 36 }
   0xe   : > { %s254_s19 = scalar_select %p253_p4, %s1011_s15, 2 }
   0xf   : > { %287 = sbr.rel (!%p282_p5) target bundleno = 24 (0x18), region = 40  ;;  %v1021_v0 = vmov (%p282_p5), 0.0  }
  0x10   : > { %s884_s20 = sshll.u32 %s254_s19, 6  ;;  %s885_s21 = sshll.u32 %s254_s19, 7  ;;  %288 = vst [vmem:[%s1387_s4] sm:$0xff] (%p282_p5), %v1021_v0  ;;  %289 = vst [vmem:[%s1387_s4 + $0x8] sm:$0xff] (%p282_p5), %v1021_v0 }
  0x11   : > { %s1074_s24 = scalar_lea.vmem %s1383_s0, %s884_s20  ;;  %s1079_s27 = scalar_lea.vmem %s1385_s2, %s885_s21  ;;  %290 = vst [vmem:[%s1387_s4 + $0x10] sm:$0xff] (%p282_p5), %v1021_v0  ;;  %291 = vst [vmem:[%s1387_s4 + $0x18] sm:$0xff] (%p282_p5), %v1021_v0 }
  0x12   : > { %292 = vst [vmem:[%s1387_s4 + $0x20] sm:$0xff] (%p282_p5), %v1021_v0  ;;  %293 = vst [vmem:[%s1387_s4 + $0x28] sm:$0xff] (%p282_p5), %v1021_v0 }
  0x13   : > { %294 = vst [vmem:[%s1387_s4 + $0x30] sm:$0xff] (%p282_p5), %v1021_v0  ;;  %295 = vst [vmem:[%s1387_s4 + $0x38] sm:$0xff] (%p282_p5), %v1021_v0 }
  0x14   : > { %296 = vst [vmem:[%s1387_s4 + $0x40] sm:$0xff] (%p282_p5), %v1021_v0  ;;  %297 = vst [vmem:[%s1387_s4 + $0x48] sm:$0xff] (%p282_p5), %v1021_v0 }
  0x15   : > { %298 = vst [vmem:[%s1387_s4 + $0x50] sm:$0xff] (%p282_p5), %v1021_v0  ;;  %299 = vst [vmem:[%s1387_s4 + $0x58] sm:$0xff] (%p282_p5), %v1021_v0 }
  0x16   : > { %300 = vst [vmem:[%s1387_s4 + $0x60] sm:$0xff] %v1021_v0  ;;  %301 = vst [vmem:[%s1387_s4 + $0x68] sm:$0xff] %v1021_v0 }
  0x17   : > { %302 = vst [vmem:[%s1387_s4 + $0x70] sm:$0xff] %v1021_v0  ;;  %303 = vst [vmem:[%s1387_s4 + $0x78] sm:$0xff] %v1021_v0 }
  0x18 PF: > { %s887_s14 = sshll.u32 %s1011_s15, 6  ;;  %v989_v1 = vld [vmem:[%s1074_s24] sm:$0xff]   ;;  %v1022_v4 = vmov 0   ;;  %v552_v9 = vld [vmem:[%s1079_s27 + $0x10] sm:$0xff]  ;;  %v553_v12 = vld [vmem:[%s1079_s27 + $0x18] sm:$0xff]  ;;  %p694_p6 = scmp.eq.s32.totalorder %s1011_s15, 2 }
  0x19   : > { %s1134_s21 = scalar_lea.vmem %s1384_s1, %s887_s14  ;;  %v990_v2 = vld [vmem:[%s1074_s24 + $0x20] sm:$0xff]   ;;  %921 = vmatprep.mubr.bf16.mxu0 %v989_v1  ;;  %980 = vset.pattern.permute.xlu1 %v1022_v4  ;;  %v551_v13 = vld [vmem:[%s1079_s27 + $0x8] sm:$0xff]  ;;  %v557_v18 = vld [vmem:[%s1079_s27 + $0x38] sm:$0xff] }
  0x1a   : > { %v981_v3 = vld [vmem:[%s1134_s21] sm:$0xff]   ;;  %v982_v5 = vld [vmem:[%s1134_s21 + $0x8] sm:$0xff]   ;;  %929 = vmatprep.mubr.bf16.mxu1 %v990_v2  ;;  %979 = vset.pattern.permute.xlu0 %v1022_v4  ;;  %v983_v6 = vld [vmem:[%s1134_s21 + $0x10] sm:$0xff]  }
  0x1b   : > { %905 = vmatprep.subr.bf16.mxu0 %v981_v3  ;;  %937 = vmatprep.subr.bf16.mxu1 %v981_v3  ;;  %v984_v7 = vld [vmem:[%s1134_s21 + $0x18] sm:$0xff]   ;;  %v985_v8 = vld [vmem:[%s1134_s21 + $0x20] sm:$0xff]   ;;  %v986_v11 = vld [vmem:[%s1134_s21 + $0x28] sm:$0xff]  }
  0x1c   : > { %906 = vmatpush3.bf16.msra.mxu0 %v981_v3  ;;  %945 = vmatpush3.bf16.msra.mxu1 %v981_v3  ;;  %v550_v10 = vld [vmem:[%s1079_s27] sm:$0xff]  ;;  %v987_v14 = vld [vmem:[%s1134_s21 + $0x30] sm:$0xff]   ;;  %v555_v15 = vld [vmem:[%s1079_s27 + $0x28] sm:$0xff] }
  0x1d   : > { %907 = vmatprep.subr.bf16.mxu0 %v982_v5  ;;  %938 = vmatprep.subr.bf16.mxu1 %v982_v5  ;;  %v554_v16 = vld [vmem:[%s1079_s27 + $0x20] sm:$0xff]  ;;  %v988_v17 = vld [vmem:[%s1134_s21 + $0x38] sm:$0xff]   ;;  %v556_v19 = vld [vmem:[%s1079_s27 + $0x30] sm:$0xff] }
  0x1e   : > { %578 = vperm.xlu1 %980, %v552_v9   ;;  %568 = vperm.xlu0 %979, %v550_v10   ;;  %v991_v20 = vld [vmem:[%s1074_s24 + $0x8] sm:$0xff]   ;;  %v558_v23 = vld [vmem:[%s1079_s27 + $0x40] sm:$0xff]  ;;  %v993_v24 = vld [vmem:[%s1074_s24 + $0x10] sm:$0xff]  }
  0x1f   : > { %v992_v21 = vld [vmem:[%s1074_s24 + $0x28] sm:$0xff]   ;;  %v994_v25 = vld [vmem:[%s1074_s24 + $0x30] sm:$0xff]   ;;  %v561_v26 = vld [vmem:[%s1079_s27 + $0x58] sm:$0xff] }
  0x20   : > { %908 = vmatpush3.bf16.msra.mxu0 %v982_v5  ;;  %946 = vmatpush3.bf16.msra.mxu1 %v982_v5  ;;  %v559_v22 = vld [vmem:[%s1079_s27 + $0x48] sm:$0xff]  ;;  %v560_v27 = vld [vmem:[%s1079_s27 + $0x50] sm:$0xff]  ;;  %v995_v28 = vld [vmem:[%s1074_s24 + $0x18] sm:$0xff]  }
  0x21   : > { %909 = vmatprep.subr.bf16.mxu0 %v983_v6  ;;  %939 = vmatprep.subr.bf16.mxu1 %v983_v6  ;;  %v996_v29 = vld [vmem:[%s1074_s24 + $0x38] sm:$0xff]   ;;  %v563_v30 = vld [vmem:[%s1079_s27 + $0x68] sm:$0xff]  ;;  %v562_v31 = vld [vmem:[%s1079_s27 + $0x60] sm:$0xff] }
  0x22   : > { %583 = vperm.xlu1 %980, %v553_v12   ;;  %573 = vperm.xlu0 %979, %v551_v13   ;;  %v565_v32 = vld [vmem:[%s1079_s27 + $0x78] sm:$0xff]  ;;  %v564_v33 = vld [vmem:[%s1079_s27 + $0x70] sm:$0xff]  ;;  %v534_v55 = vld [vmem:[%s1387_s4] sm:$0xff] }
  0x23   : > { %v536_v49 = vld [vmem:[%s1387_s4 + $0x10] sm:$0xff]  ;;  %v542_v57 = vld [vmem:[%s1387_s4 + $0x40] sm:$0xff]  ;;  %v537_v61 = vld [vmem:[%s1387_s4 + $0x18] sm:$0xff] }
  0x24   : > { %910 = vmatpush3.bf16.msra.mxu0 %v983_v6  ;;  %947 = vmatpush3.bf16.msra.mxu1 %v983_v6  ;;  %v544_v51 = vld [vmem:[%s1387_s4 + $0x50] sm:$0xff]  ;;  %v545_v63 = vld [vmem:[%s1387_s4 + $0x58] sm:$0xff]  ;;  %v535_v5 = vld [vmem:[%s1387_s4 + $0x8] sm:$0xff] }
  0x25   : > { %911 = vmatprep.subr.bf16.mxu0 %v984_v7  ;;  %940 = vmatprep.subr.bf16.mxu1 %v984_v7 }
  0x26   : > { %593 = vperm.xlu1 %980, %v555_v15   ;;  %588 = vperm.xlu0 %979, %v554_v16  }
  0x28   : > { %912 = vmatpush3.bf16.msra.mxu0 %v984_v7  ;;  %948 = vmatpush3.bf16.msra.mxu1 %v984_v7  ;;  %v543_v7 = vld [vmem:[%s1387_s4 + $0x48] sm:$0xff] }
  0x29   : > { %913 = vmatprep.subr.bf16.mxu0 %v985_v8  ;;  %941 = vmatprep.subr.bf16.mxu1 %v985_v8 }
  0x2a   : > { %603 = vperm.xlu1 %980, %v557_v18   ;;  %598 = vperm.xlu0 %979, %v556_v19   ;;  %v540_v19 = vld [vmem:[%s1387_s4 + $0x30] sm:$0xff] }
  0x2c   : > { %914 = vmatpush3.bf16.msra.mxu0 %v985_v8  ;;  %949 = vmatpush3.bf16.msra.mxu1 %v985_v8 }
  0x2d   : > { %915 = vmatprep.subr.bf16.mxu0 %v986_v11  ;;  %942 = vmatprep.subr.bf16.mxu1 %v986_v11 }
  0x2e   : > { %613 = vperm.xlu1 %980, %v559_v22   ;;  %608 = vperm.xlu0 %979, %v558_v23  }
  0x30   : > { %916 = vmatpush3.bf16.msra.mxu0 %v986_v11  ;;  %950 = vmatpush3.bf16.msra.mxu1 %v986_v11 }
  0x31   : > { %917 = vmatprep.subr.bf16.mxu0 %v987_v14  ;;  %943 = vmatprep.subr.bf16.mxu1 %v987_v14 }
  0x32   : > { %623 = vperm.xlu1 %980, %v561_v26   ;;  %618 = vperm.xlu0 %979, %v560_v27   ;;  %v546_v27 = vld [vmem:[%s1387_s4 + $0x60] sm:$0xff] }
  0x34   : > { %918 = vmatpush3.bf16.msra.mxu0 %v987_v14  ;;  %951 = vmatpush3.bf16.msra.mxu1 %v987_v14 }
  0x35   : > { %919 = vmatprep.subr.bf16.mxu0 %v988_v17  ;;  %944 = vmatprep.subr.bf16.mxu1 %v988_v17 }
  0x36   : > { %633 = vperm.xlu1 %980, %v563_v30   ;;  %628 = vperm.xlu0 %979, %v562_v31   ;;  %v541_v31 = vld [vmem:[%s1387_s4 + $0x38] sm:$0xff] }
  0x38   : > { %920 = vmatpush3.bf16.msra.mxu0 %v988_v17  ;;  %952 = vmatpush3.bf16.msra.mxu1 %v988_v17 }
  0x3a   : > { %643 = vperm.xlu1 %980, %v565_v32   ;;  %638 = vperm.xlu0 %979, %v564_v33   ;;  %v549_v33 = vld [vmem:[%s1387_s4 + $0x78] sm:$0xff] }
  0x3b   : > { %922 = vmatmul.mubr.bf16.vlgmr.msra.gmra.mrb[0].mxu0 %v991_v20  ;;  %930 = vmatmul.mubr.bf16.vlgmr.msra.gmra.mrb[0].mxu1 %v992_v21  ;;  %v548_v21 = vld [vmem:[%s1387_s4 + $0x70] sm:$0xff] }
  0x3c   : > { %925 = vmatprep.mubr.bf16.mxu0 %v993_v24  ;;  %933 = vmatprep.mubr.bf16.mxu1 %v994_v25  ;;  %v538_v25 = vld [vmem:[%s1387_s4 + $0x20] sm:$0xff] }
  0x43   : > { %926 = vmatmul.mubr.bf16.gmra.mrb[4].mxu0 %v995_v28  ;;  %934 = vmatmul.mubr.bf16.gmra.mrb[4].mxu1 %v996_v29 }
  0x9d   : > { %v579_v34 = vpop.permute.xlu1 %578  ;;  %v569_v35 = vpop.permute.xlu0 %568 }
  0xa1   : > { %v584_v36 = vpop.permute.xlu1 %583  ;;  %v574_v37 = vpop.permute.xlu0 %573 }
  0xa5   : > { %v1168_v38 = vpop.permute.xlu1 %593  ;;  %v589_v39 = vpop.permute.xlu0 %588 }
  0xa9   : > { %v1170_v40 = vpop.permute.xlu1 %603  ;;  %v599_v41 = vpop.permute.xlu0 %598 }
  0xad   : > { %v614_v42 = vpop.permute.xlu1 %613  ;;  %v609_v43 = vpop.permute.xlu0 %608 }
  0xb1   : > { %v624_v44 = vpop.permute.xlu1 %623  ;;  %v619_v45 = vpop.permute.xlu0 %618 }
  0xb5   : > { %v1172_v46 = vpop.permute.xlu1 %633  ;;  %v629_v47 = vpop.permute.xlu0 %628 }
  0xb9   : > { %v644_v16 = vpop.permute.xlu1 %643  ;;  %v639_v17 = vpop.permute.xlu0 %638 }
 0x10e   : > { %v923_v48 = vpop.f32.mrb[0].mxu0  ;;  %v931_v50 = vpop.f32.mrb[0].mxu1 }
 0x10f   : > { %v648_v52 = vmul.f32 %v923_v48, %v579_v34  ;;  %v656_v53 = vmul.f32 %v931_v50, %v619_v45  ;;  %v471_v54 = vpop.f32.mrb[1].mxu0  ;;  %v503_v56 = vpop.f32.mrb[1].mxu1 }
 0x110   : > { %v646_v58 = vmul.f32 %v569_v35, %v471_v54  ;;  %v654_v59 = vmul.f32 %v609_v43, %v503_v56  ;;  %v924_v60 = vpop.f32.mrb[2].mxu0  ;;  %v932_v62 = vpop.f32.mrb[2].mxu1  ;;  %v547_v43 = vld [vmem:[%s1387_s4 + $0x68] sm:$0xff] }
 0x111   : > { %v664_v0 = vadd.f32 %v648_v52, %v536_v49  ;;  %v672_v1 = vadd.f32 %v656_v53, %v544_v51  ;;  %v649_v2 = vmul.f32 %v924_v60, %v584_v36  ;;  %v657_v3 = vmul.f32 %v932_v62, %v624_v44  ;;  %v474_v4 = vpop.f32.mrb[3].mxu0  ;;  %v506_v6 = vpop.f32.mrb[3].mxu1  ;;  %v879_v51 = vld [vmem:[%s1386_s3] ss:$0 sm:$0xff] (%p694_p6) }
 0x112   : > { %v662_v8 = vadd.f32 %v646_v58, %v534_v55  ;;  %v670_v9 = vadd.f32 %v654_v59, %v542_v57  ;;  %v647_v10 = vmul.f32 %v574_v37, %v474_v4  ;;  %v655_v11 = vmul.f32 %v614_v42, %v506_v6 }
 0x113   : > { %680 = vst [vmem:[%s1387_s4 + $0x10] sm:$0xff] %v664_v0  ;;  %688 = vst [vmem:[%s1387_s4 + $0x50] sm:$0xff] %v672_v1  ;;  %v665_v12 = vadd.f32 %v649_v2, %v537_v61  ;;  %v673_v13 = vadd.f32 %v657_v3, %v545_v63 }
 0x114   : > { %678 = vst [vmem:[%s1387_s4] sm:$0xff] %v662_v8  ;;  %686 = vst [vmem:[%s1387_s4 + $0x40] sm:$0xff] %v670_v9  ;;  %v663_v14 = vadd.f32 %v647_v10, %v535_v5  ;;  %v671_v15 = vadd.f32 %v655_v11, %v543_v7 }
 0x115   : > { %681 = vst [vmem:[%s1387_s4 + $0x18] sm:$0xff] %v665_v12  ;;  %689 = vst [vmem:[%s1387_s4 + $0x58] sm:$0xff] %v673_v13 }
 0x116   : > { %679 = vst [vmem:[%s1387_s4 + $0x8] sm:$0xff] %v663_v14  ;;  %687 = vst [vmem:[%s1387_s4 + $0x48] sm:$0xff] %v671_v15  ;;  %v927_v18 = vpop.f32.mrb[4].mxu0  ;;  %v935_v20 = vpop.f32.mrb[4].mxu1 }
 0x117   : > { %v652_v22 = vmul.f32 %v927_v18, %v599_v41  ;;  %v660_v23 = vmul.f32 %v935_v20, %v639_v17  ;;  %v487_v24 = vpop.f32.mrb[5].mxu0  ;;  %v519_v26 = vpop.f32.mrb[5].mxu1 }
 0x118   : > { %v650_v28 = vmul.f32 %v589_v39, %v487_v24  ;;  %v658_v29 = vmul.f32 %v629_v47, %v519_v26  ;;  %v928_v30 = vpop.f32.mrb[6].mxu0  ;;  %v936_v32 = vpop.f32.mrb[6].mxu1  ;;  %v539_v39 = vld [vmem:[%s1387_s4 + $0x28] sm:$0xff]  ;;  %698 = sbr.rel (!%p694_p6) target bundleno = 298 (0x12a), region = 44 }
 0x119   : > { %v668_v34 = vadd.f32 %v652_v22, %v540_v19  ;;  %v676_v35 = vadd.f32 %v660_v23, %v548_v21  ;;  %v653_v36 = vmul.f32 %v928_v30, %v1170_v40  ;;  %v661_v37 = vmul.f32 %v936_v32, %v644_v16  ;;  %v490_v41 = vpop.f32.mrb[7].mxu0  ;;  %v522_v42 = vpop.f32.mrb[7].mxu1 }
 0x11a   : > { %v666_v44 = vadd.f32 %v650_v28, %v538_v25  ;;  %v674_v45 = vadd.f32 %v658_v29, %v546_v27  ;;  %v651_v47 = vmul.f32 %v1168_v38, %v490_v41  ;;  %v659_v48 = vmul.f32 %v1172_v46, %v522_v42  ;;  %v701_v55 = vld [vmem:[%s1387_s4 + $0x10] sm:$0xff] (%p694_p6) }
 0x11b   : > { %684 = vst [vmem:[%s1387_s4 + $0x30] sm:$0xff] %v668_v34  ;;  %692 = vst [vmem:[%s1387_s4 + $0x70] sm:$0xff] %v676_v35  ;;  %v669_v40 = vadd.f32 %v653_v36, %v541_v31  ;;  %v677_v49 = vadd.f32 %v661_v37, %v549_v33  ;;  %v699_v50 = vld [vmem:[%s1387_s4] sm:$0xff] (%p694_p6)  ;;  %v724_v58 = vadd.f32 (%p694_p6), %v879_v51, %v701_v55  ;;  %v709_v5 = vld [vmem:[%s1387_s4 + $0x50] sm:$0xff] (%p694_p6) }
 0x11c   : > { %682 = vst [vmem:[%s1387_s4 + $0x20] sm:$0xff] %v666_v44  ;;  %690 = vst [vmem:[%s1387_s4 + $0x60] sm:$0xff] %v674_v45  ;;  %v667_v38 = vadd.f32 %v651_v47, %v539_v39  ;;  %v675_v46 = vadd.f32 %v659_v48, %v547_v43  ;;  %v722_v53 = vadd.f32 (%p694_p6), %v879_v51, %v699_v50  ;;  %v702_v56 = vld [vmem:[%s1387_s4 + $0x18] sm:$0xff] (%p694_p6)  ;;  %v707_v3 = vld [vmem:[%s1387_s4 + $0x40] sm:$0xff] (%p694_p6) }
 0x11d   : > { %685 = vst [vmem:[%s1387_s4 + $0x38] sm:$0xff] %v669_v40  ;;  %693 = vst [vmem:[%s1387_s4 + $0x78] sm:$0xff] %v677_v49  ;;  %v700_v52 = vld [vmem:[%s1387_s4 + $0x8] sm:$0xff] (%p694_p6)  ;;  %v725_v59 = vadd.f32 (%p694_p6), %v879_v51, %v702_v56  ;;  %v730_v6 = vadd.f32 (%p694_p6), %v879_v51, %v707_v3  ;;  %v732_v8 = vadd.f32 (%p694_p6), %v879_v51, %v709_v5  ;;  %v710_v9 = vld [vmem:[%s1387_s4 + $0x58] sm:$0xff] (%p694_p6) }
 0x11e   : > { %683 = vst [vmem:[%s1387_s4 + $0x28] sm:$0xff] %v667_v38  ;;  %691 = vst [vmem:[%s1387_s4 + $0x68] sm:$0xff] %v675_v46  ;;  %v723_v54 = vadd.f32 (%p694_p6), %v879_v51, %v700_v52  ;;  %v708_v4 = vld [vmem:[%s1387_s4 + $0x48] sm:$0xff] (%p694_p6)  ;;  %v733_v12 = vadd.f32 (%p694_p6), %v879_v51, %v710_v9 }
 0x11f   : > { %738 = vst [vmem:[%s1387_s4] sm:$0xff] %v722_v53  ;;  %740 = vst [vmem:[%s1387_s4 + $0x10] sm:$0xff] %v724_v58  ;;  %v731_v7 = vadd.f32 %v879_v51, %v708_v4 }
 0x120   : > { %739 = vst [vmem:[%s1387_s4 + $0x8] sm:$0xff] %v723_v54  ;;  %741 = vst [vmem:[%s1387_s4 + $0x18] sm:$0xff] %v725_v59 }
 0x121   : > { %746 = vst [vmem:[%s1387_s4 + $0x40] sm:$0xff] %v730_v6  ;;  %747 = vst [vmem:[%s1387_s4 + $0x48] sm:$0xff] %v731_v7 }
 0x122   : > { %v705_v62 = vld [vmem:[%s1387_s4 + $0x30] sm:$0xff]  ;;  %748 = vst [vmem:[%s1387_s4 + $0x50] sm:$0xff] %v732_v8  ;;  %749 = vst [vmem:[%s1387_s4 + $0x58] sm:$0xff] %v733_v12 }
 0x123   : > { %v703_v57 = vld [vmem:[%s1387_s4 + $0x20] sm:$0xff]  ;;  %v728_v1 = vadd.f32 %v879_v51, %v705_v62  ;;  %v713_v15 = vld [vmem:[%s1387_s4 + $0x70] sm:$0xff] }
 0x124   : > { %v726_v60 = vadd.f32 %v879_v51, %v703_v57  ;;  %v706_v63 = vld [vmem:[%s1387_s4 + $0x38] sm:$0xff]  ;;  %v711_v10 = vld [vmem:[%s1387_s4 + $0x60] sm:$0xff]  ;;  %v736_v17 = vadd.f32 %v879_v51, %v713_v15 }
 0x125   : > { %v704_v61 = vld [vmem:[%s1387_s4 + $0x28] sm:$0xff]  ;;  %v729_v2 = vadd.f32 %v879_v51, %v706_v63  ;;  %744 = vst [vmem:[%s1387_s4 + $0x30] sm:$0xff] %v728_v1  ;;  %v734_v13 = vadd.f32 %v879_v51, %v711_v10  ;;  %v714_v16 = vld [vmem:[%s1387_s4 + $0x78] sm:$0xff] }
 0x126   : > { %v727_v0 = vadd.f32 %v879_v51, %v704_v61  ;;  %742 = vst [vmem:[%s1387_s4 + $0x20] sm:$0xff] %v726_v60  ;;  %v712_v11 = vld [vmem:[%s1387_s4 + $0x68] sm:$0xff]  ;;  %v737_v18 = vadd.f32 %v879_v51, %v714_v16  ;;  %752 = vst [vmem:[%s1387_s4 + $0x70] sm:$0xff] %v736_v17 }
 0x127   : > { %745 = vst [vmem:[%s1387_s4 + $0x38] sm:$0xff] %v729_v2  ;;  %v735_v14 = vadd.f32 %v879_v51, %v712_v11  ;;  %750 = vst [vmem:[%s1387_s4 + $0x60] sm:$0xff] %v734_v13 }
 0x128   : > { %743 = vst [vmem:[%s1387_s4 + $0x28] sm:$0xff] %v727_v0  ;;  %753 = vst [vmem:[%s1387_s4 + $0x78] sm:$0xff] %v737_v18 }
 0x129   : > { %751 = vst [vmem:[%s1387_s4 + $0x68] sm:$0xff] %v735_v14 }
 0x12a PF: > { %s14_s17 = sadd.s32 1, %s1019_s17   ;;  %s1388_s15 = smov %s1015_s16 }
 0x12b   : > { %p11_p7 = scmp.ge.s32.totalorder %s14_s17, 5   ;;  %s1389_s16 = smov %s1391_s18 }
 0x12d   :  { %13 = sbr.rel (!%p11_p7) target bundleno = 2 (0x2), region = 78 }

// kernel: rgcn_forward.2
= control target key start
LH: loop header
LB: loop body
LE: loop exit
PB: predicated region body
PF: predicated region fallthrough
CT: control target
= control target key end

     0   :  { %s1482_s18 = smov 0   ;;  %s1484_s19 = smov 0   ;;  %s1829_s0 = inlined_call_operand.vmem [shape: bf16[3,128,128], index: 0, kind: input, shape index: {}]   ;;  %s1830_s1 = inlined_call_operand.vmem [shape: bf16[3,1,128,128], index: 1, kind: input, shape index: {}]   ;;  %s1831_s2 = inlined_call_operand.vmem [shape: f32[3,128,128], index: 2, kind: input, shape index: {}]   ;;  %s1832_s3 = inlined_call_operand.vmem [shape: f32[3,128,1], index: 3, kind: input, shape index: {}]   ;;  %s1833_s4 = inlined_call_operand.vmem [shape: f32[1,128], index: 4, kind: input, shape index: {}]   ;;  %s1834_s5 = inlined_call_operand.vmem [shape: f32[128,128], index: 5, kind: output, shape index: {}]  }
   0x1   :  { %s1486_s20 = smov 0  }
   0x2 LB: > { %s30_s21 = sadd.s32 1, %s1444_s19  ;;  %p1176_p0 = scmp.ge.s32.totalorder %s1448_s20, 1  ;;  %s1448_s20 = sphi %s1486_s20, %s15_s20   ;;  %s1444_s19 = sphi %s1484_s19, %s1836_s19   ;;  %s1440_s18 = sphi %s1482_s18, %s1835_s18  }
   0x3   : > { %p32_p1 = scmp.ge.s32.totalorder %s30_s21, 3  ;;  %p245_p2 = scmp.lt.s32.totalorder %s1448_s20, 4 }
   0x5   : > { %s1838_s21 = smov (%p32_p1, %s30_s21), 0  ;;  %p246_p3 = pnand %p1176_p0, %p245_p2 }
   0x6   : > { %p295_p4 = scmp.lt.s32.totalorder (!%p246_p3), %s1440_s18, 2  ;;  %p329_p5 = scmp.eq.s32.totalorder (!%p246_p3), %s1440_s18, 0 }
   0x7   : > { %249 = sbr.rel (%p246_p3) target bundleno = 532 (0x214), region = 40 }
   0xe   : > { %s296_s22 = scalar_select %p295_p4, %s1440_s18, 2 }
   0xf   : > { %334 = sbr.rel (!%p329_p5) target bundleno = 24 (0x18), region = 44  ;;  %v1450_v0 = vmov (%p329_p5), 0.0  }
  0x10   : > { %s1208_s23 = sshll.u32 %s296_s22, 6  ;;  %s1209_s24 = sshll.u32 %s296_s22, 7  ;;  %335 = vst [vmem:[%s1834_s5] sm:$0xff] (%p329_p5), %v1450_v0  ;;  %336 = vst [vmem:[%s1834_s5 + $0x8] sm:$0xff] (%p329_p5), %v1450_v0 }
  0x11   : > { %s1508_s27 = scalar_lea.vmem %s1829_s0, %s1208_s23  ;;  %s1513_s30 = scalar_lea.vmem %s1831_s2, %s1209_s24  ;;  %337 = vst [vmem:[%s1834_s5 + $0x10] sm:$0xff] (%p329_p5), %v1450_v0  ;;  %338 = vst [vmem:[%s1834_s5 + $0x18] sm:$0xff] (%p329_p5), %v1450_v0 }
  0x12   : > { %s1518_s8 = scalar_lea.vmem %s1832_s3, %s1209_s24  ;;  %339 = vst [vmem:[%s1834_s5 + $0x20] sm:$0xff] (%p329_p5), %v1450_v0  ;;  %340 = vst [vmem:[%s1834_s5 + $0x28] sm:$0xff] (%p329_p5), %v1450_v0 }
  0x13   : > { %341 = vst [vmem:[%s1834_s5 + $0x30] sm:$0xff] (%p329_p5), %v1450_v0  ;;  %342 = vst [vmem:[%s1834_s5 + $0x38] sm:$0xff] (%p329_p5), %v1450_v0 }
  0x14   : > { %343 = vst [vmem:[%s1834_s5 + $0x40] sm:$0xff] (%p329_p5), %v1450_v0  ;;  %344 = vst [vmem:[%s1834_s5 + $0x48] sm:$0xff] (%p329_p5), %v1450_v0 }
  0x15   : > { %345 = vst [vmem:[%s1834_s5 + $0x50] sm:$0xff] (%p329_p5), %v1450_v0  ;;  %346 = vst [vmem:[%s1834_s5 + $0x58] sm:$0xff] (%p329_p5), %v1450_v0 }
  0x16   : > { %347 = vst [vmem:[%s1834_s5 + $0x60] sm:$0xff] %v1450_v0  ;;  %348 = vst [vmem:[%s1834_s5 + $0x68] sm:$0xff] %v1450_v0 }
  0x17   : > { %349 = vst [vmem:[%s1834_s5 + $0x70] sm:$0xff] %v1450_v0  ;;  %350 = vst [vmem:[%s1834_s5 + $0x78] sm:$0xff] %v1450_v0 }
  0x18 PF: > { %s1212_s28 = sshll.u32 %s1440_s18, 6  ;;  %v1418_v1 = vld [vmem:[%s1508_s27] sm:$0xff]   ;;  %v668_v8 = vld [vmem:[%s1513_s30 + $0x8] sm:$0xff]  ;;  %v669_v9 = vld [vmem:[%s1513_s30 + $0x10] sm:$0xff]  ;;  %v1451_v43 = vmov 0   ;;  %p988_p6 = scmp.eq.s32.totalorder %s1440_s18, 2 }
  0x19   : > { %s1573_s7 = scalar_lea.vmem %s1830_s1, %s1212_s28  ;;  %1278 = vmatprep.mubr.bf16.mxu0 %v1418_v1  ;;  %v667_v7 = vld [vmem:[%s1513_s30] sm:$0xff]  ;;  %v670_v11 = vld [vmem:[%s1513_s30 + $0x18] sm:$0xff]  ;;  %v672_v15 = vld [vmem:[%s1513_s30 + $0x28] sm:$0xff]  ;;  %1409 = vset.pattern.permute.xlu1 %v1451_v43 }
  0x1a   : > { %v1410_v2 = vld [vmem:[%s1573_s7] sm:$0xff]   ;;  %v1411_v3 = vld [vmem:[%s1573_s7 + $0x8] sm:$0xff]   ;;  %v1412_v4 = vld [vmem:[%s1573_s7 + $0x10] sm:$0xff]   ;;  %v1350_v10 = vpack.c.bf16 %v668_v8, %v667_v7  ;;  %v1354_v13 = vpack.c.bf16 %v670_v11, %v669_v9  ;;  %1408 = vset.pattern.permute.xlu0 %v1451_v43 }
  0x1b   : > { %1262 = vmatprep.subr.bf16.mxu0 %v1410_v2  ;;  %v1413_v5 = vld [vmem:[%s1573_s7 + $0x18] sm:$0xff]   ;;  %v1414_v6 = vld [vmem:[%s1573_s7 + $0x20] sm:$0xff]   ;;  %v1415_v12 = vld [vmem:[%s1573_s7 + $0x28] sm:$0xff]  }
  0x1c   : > { %1263 = vmatpush3.bf16.msra.mxu0 %v1410_v2  ;;  %v671_v14 = vld [vmem:[%s1513_s30 + $0x20] sm:$0xff]  ;;  %1351 = vmatprep.subr.bf16.mxu1 %v1350_v10  ;;  %v1416_v17 = vld [vmem:[%s1573_s7 + $0x30] sm:$0xff]   ;;  %v674_v19 = vld [vmem:[%s1513_s30 + $0x38] sm:$0xff] }
  0x1d   : > { %1264 = vmatprep.subr.bf16.mxu0 %v1411_v3  ;;  %1353 = vmatpush3.bf16.msra.mxu1 %v1350_v10  ;;  %v1358_v16 = vpack.c.bf16 %v672_v15, %v671_v14  ;;  %v673_v18 = vld [vmem:[%s1513_s30 + $0x30] sm:$0xff]  ;;  %v1417_v21 = vld [vmem:[%s1573_s7 + $0x38] sm:$0xff]   ;;  %v675_v22 = vld [vmem:[%s1513_s30 + $0x40] sm:$0xff] }
  0x1e   : > { %1355 = vmatprep.subr.bf16.mxu1 %v1354_v13  ;;  %v1362_v20 = vpack.c.bf16 %v674_v19, %v673_v18  ;;  %v676_v23 = vld [vmem:[%s1513_s30 + $0x48] sm:$0xff]  ;;  %v677_v25 = vld [vmem:[%s1513_s30 + $0x50] sm:$0xff]  ;;  %v678_v26 = vld [vmem:[%s1513_s30 + $0x58] sm:$0xff] }
  0x1f   : > { %v1366_v24 = vpack.c.bf16 %v676_v23, %v675_v22  ;;  %v1419_v27 = vld [vmem:[%s1508_s27 + $0x8] sm:$0xff]   ;;  %v1420_v28 = vld [vmem:[%s1508_s27 + $0x10] sm:$0xff]   ;;  %v1370_v29 = vpack.c.bf16 %v678_v26, %v677_v25  ;;  %v679_v30 = vld [vmem:[%s1513_s30 + $0x60] sm:$0xff] }
  0x20   : > { %1265 = vmatpush3.bf16.msra.mxu0 %v1411_v3  ;;  %v680_v31 = vld [vmem:[%s1513_s30 + $0x68] sm:$0xff]  ;;  %v1421_v33 = vld [vmem:[%s1508_s27 + $0x18] sm:$0xff]   ;;  %v1422_v34 = vld [vmem:[%s1508_s27 + $0x20] sm:$0xff]  }
  0x21   : > { %1266 = vmatprep.subr.bf16.mxu0 %v1412_v4  ;;  %1357 = vmatpush3.bf16.msra.mxu1 %v1354_v13  ;;  %v1374_v32 = vpack.c.bf16 %v680_v31, %v679_v30  ;;  %v1423_v35 = vld [vmem:[%s1508_s27 + $0x28] sm:$0xff]   ;;  %v1424_v36 = vld [vmem:[%s1508_s27 + $0x30] sm:$0xff]   ;;  %v1425_v37 = vld [vmem:[%s1508_s27 + $0x38] sm:$0xff]  }
  0x22   : > { %1359 = vmatprep.subr.bf16.mxu1 %v1358_v16  ;;  %v681_v38 = vld [vmem:[%s1513_s30 + $0x70] sm:$0xff]  ;;  %v682_v39 = vld [vmem:[%s1513_s30 + $0x78] sm:$0xff]  ;;  %v844_v42 = vld [vmem:[%s1518_s8] sm:$0xff] }
  0x23   : > { %v1378_v40 = vpack.c.bf16 %v682_v39, %v681_v38  ;;  %v846_v41 = vld [vmem:[%s1518_s8 + $0x10] sm:$0xff]  ;;  %862 = vperm.xlu0 %1408, %v844_v42   ;;  %v847_v44 = vld [vmem:[%s1518_s8 + $0x18] sm:$0xff]  ;;  %v845_v45 = vld [vmem:[%s1518_s8 + $0x8] sm:$0xff] }
  0x24   : > { %1267 = vmatpush3.bf16.msra.mxu0 %v1412_v4  ;;  %872 = vperm.xlu1 %1409, %v846_v41   ;;  %v849_v46 = vld [vmem:[%s1518_s8 + $0x28] sm:$0xff]  ;;  %v848_v47 = vld [vmem:[%s1518_s8 + $0x20] sm:$0xff]  ;;  %v851_v48 = vld [vmem:[%s1518_s8 + $0x38] sm:$0xff] }
  0x25   : > { %1268 = vmatprep.subr.bf16.mxu0 %v1413_v5  ;;  %1361 = vmatpush3.bf16.msra.mxu1 %v1358_v16  ;;  %v850_v49 = vld [vmem:[%s1518_s8 + $0x30] sm:$0xff]  ;;  %v853_v50 = vld [vmem:[%s1518_s8 + $0x48] sm:$0xff]  ;;  %v852_v51 = vld [vmem:[%s1518_s8 + $0x40] sm:$0xff] }
  0x26   : > { %1363 = vmatprep.subr.bf16.mxu1 %v1362_v20  ;;  %v855_v52 = vld [vmem:[%s1518_s8 + $0x58] sm:$0xff]  ;;  %v854_v53 = vld [vmem:[%s1518_s8 + $0x50] sm:$0xff]  ;;  %v857_v54 = vld [vmem:[%s1518_s8 + $0x68] sm:$0xff] }
  0x27   : > { %867 = vperm.xlu0 %1408, %v845_v45   ;;  %v856_v55 = vld [vmem:[%s1518_s8 + $0x60] sm:$0xff]  ;;  %v859_v56 = vld [vmem:[%s1518_s8 + $0x78] sm:$0xff]  ;;  %v858_v57 = vld [vmem:[%s1518_s8 + $0x70] sm:$0xff] }
  0x28   : > { %1269 = vmatpush3.bf16.msra.mxu0 %v1413_v5  ;;  %877 = vperm.xlu1 %1409, %v847_v44   ;;  %v831_v26 = vld [vmem:[%s1834_s5 + $0x18] sm:$0xff]  ;;  %v830_v30 = vld [vmem:[%s1834_s5 + $0x10] sm:$0xff]  ;;  %v832_v38 = vld [vmem:[%s1834_s5 + $0x20] sm:$0xff] }
  0x29   : > { %1270 = vmatprep.subr.bf16.mxu0 %v1414_v6  ;;  %1365 = vmatpush3.bf16.msra.mxu1 %v1362_v20  ;;  %v828_v20 = vld [vmem:[%s1834_s5] sm:$0xff]  ;;  %v835_v45 = vld [vmem:[%s1834_s5 + $0x38] sm:$0xff] }
  0x2a   : > { %1367 = vmatprep.subr.bf16.mxu1 %v1366_v24 }
  0x2b   : > { %882 = vperm.xlu0 %1408, %v848_v47  }
  0x2c   : > { %1271 = vmatpush3.bf16.msra.mxu0 %v1414_v6  ;;  %887 = vperm.xlu1 %1409, %v849_v46  }
  0x2d   : > { %1272 = vmatprep.subr.bf16.mxu0 %v1415_v12  ;;  %1369 = vmatpush3.bf16.msra.mxu1 %v1366_v24 }
  0x2e   : > { %1371 = vmatprep.subr.bf16.mxu1 %v1370_v29 }
  0x2f   : > { %892 = vperm.xlu0 %1408, %v850_v49  }
  0x30   : > { %1273 = vmatpush3.bf16.msra.mxu0 %v1415_v12  ;;  %897 = vperm.xlu1 %1409, %v851_v48   ;;  %v834_v48 = vld [vmem:[%s1834_s5 + $0x30] sm:$0xff] }
  0x31   : > { %1274 = vmatprep.subr.bf16.mxu0 %v1416_v17  ;;  %1373 = vmatpush3.bf16.msra.mxu1 %v1370_v29 }
  0x32   : > { %1375 = vmatprep.subr.bf16.mxu1 %v1374_v32 }
  0x33   : > { %902 = vperm.xlu0 %1408, %v852_v51  }
  0x34   : > { %1275 = vmatpush3.bf16.msra.mxu0 %v1416_v17  ;;  %907 = vperm.xlu1 %1409, %v853_v50   ;;  %v829_v17 = vld [vmem:[%s1834_s5 + $0x8] sm:$0xff] }
  0x35   : > { %1276 = vmatprep.subr.bf16.mxu0 %v1417_v21  ;;  %1377 = vmatpush3.bf16.msra.mxu1 %v1374_v32 }
  0x36   : > { %1379 = vmatprep.subr.bf16.mxu1 %v1378_v40 }
  0x37   : > { %912 = vperm.xlu0 %1408, %v854_v53  }
  0x38   : > { %1277 = vmatpush3.bf16.msra.mxu0 %v1417_v21  ;;  %917 = vperm.xlu1 %1409, %v855_v52  }
  0x39   : > { %1381 = vmatpush3.bf16.msra.mxu1 %v1378_v40 }
  0x3b   : > { %1279 = vmatmul.mubr.bf16.vlgmr.msra.gmra.mrb[0].mxu0 %v1419_v27  ;;  %922 = vperm.xlu0 %1408, %v856_v55  }
  0x3c   : > { %1282 = vmatprep.mubr.bf16.mxu0 %v1420_v28  ;;  %927 = vperm.xlu1 %1409, %v857_v54   ;;  %v837_v54 = vld [vmem:[%s1834_s5 + $0x48] sm:$0xff] }
  0x3f   : > { %932 = vperm.xlu0 %1408, %v858_v57  }
  0x40   : > { %937 = vperm.xlu1 %1409, %v859_v56  }
  0x43   : > { %1283 = vmatmul.mubr.bf16.gmra.mrb[4].mxu0 %v1421_v33 }
  0x44   : > { %1286 = vmatprep.mubr.bf16.mxu0 %v1422_v34 }
  0x4b   : > { %1287 = vmatmul.mubr.bf16.gmra.mrb[8].mxu0 %v1423_v35  ;;  %v833_v35 = vld [vmem:[%s1834_s5 + $0x28] sm:$0xff] }
  0x4c   : > { %1290 = vmatprep.mubr.bf16.mxu0 %v1424_v36 }
  0x53   : > { %1291 = vmatmul.mubr.bf16.gmra.mrb[12].mxu0 %v1425_v37 }
  0xa2   : > { %v863_v11 = vpop.permute.xlu0 %862 }
  0xa3   : > { %v873_v10 = vpop.permute.xlu1 %872 }
  0xa6   : > { %v868_v13 = vpop.permute.xlu0 %867 }
  0xa7   : > { %v878_v12 = vpop.permute.xlu1 %877 }
  0xaa   : > { %v883_v15 = vpop.permute.xlu0 %882 }
  0xab   : > { %v888_v14 = vpop.permute.xlu1 %887 }
  0xae   : > { %v893_v27 = vpop.permute.xlu0 %892 }
  0xaf   : > { %v898_v23 = vpop.permute.xlu1 %897 }
  0xb2   : > { %v903_v41 = vpop.permute.xlu0 %902 }
  0xb3   : > { %v908_v39 = vpop.permute.xlu1 %907 }
  0xb6   : > { %v913_v55 = vpop.permute.xlu0 %912 }
  0xb7   : > { %v918_v51 = vpop.permute.xlu1 %917 }
 0x10e   : > { %v1280_v58 = vpop.f32.mrb[0].mxu0 }
 0x10f   : > { %v553_v59 = vpop.f32.mrb[1].mxu0 }
 0x110   : > { %v1281_v60 = vpop.f32.mrb[2].mxu0  ;;  %1326 = vmatprep.mubr.f32.mxu1 %v553_v59 }
 0x111   : > { %v556_v61 = vpop.f32.mrb[3].mxu0 }
 0x112   : > { %1327 = vmatmul.mubr.f32.vlgmr.msra.gmra.mrb[0].mxu1 %v556_v61 }
 0x113   : > { %1329 = vmatprep.mubr.f32.mxu1 %v1280_v58  ;;  %v836_v58 = vld [vmem:[%s1834_s5 + $0x40] sm:$0xff] }
 0x116   : > { %v1284_v62 = vpop.f32.mrb[4].mxu0  ;;  %1330 = vmatmul.mubr.f32.gmra.mrb[2].mxu1 %v1281_v60 }
 0x117   : > { %v569_v63 = vpop.f32.mrb[5].mxu0 }
 0x118   : > { %v1285_v0 = vpop.f32.mrb[6].mxu0  ;;  %1332 = vmatprep.mubr.f32.mxu1 %v569_v63  ;;  %v839_v63 = vld [vmem:[%s1834_s5 + $0x58] sm:$0xff] }
 0x119   : > { %v572_v1 = vpop.f32.mrb[7].mxu0 }
 0x11a   : > { %1333 = vmatmul.mubr.f32.gmra.mrb[4].mxu1 %v572_v1 }
 0x11b   : > { %1335 = vmatprep.mubr.f32.mxu1 %v1284_v62 }
 0x11e   : > { %v1288_v2 = vpop.f32.mrb[8].mxu0  ;;  %1336 = vmatmul.mubr.f32.gmra.mrb[6].mxu1 %v1285_v0 }
 0x11f   : > { %v585_v3 = vpop.f32.mrb[9].mxu0 }
 0x120   : > { %v1289_v4 = vpop.f32.mrb[10].mxu0  ;;  %1338 = vmatprep.mubr.f32.mxu1 %v585_v3  ;;  %v928_v3 = vpop.permute.xlu1 %927 }
 0x121   : > { %v588_v5 = vpop.f32.mrb[11].mxu0 }
 0x122   : > { %1339 = vmatmul.mubr.f32.gmra.mrb[8].mxu1 %v588_v5  ;;  %v923_v5 = vpop.permute.xlu0 %922 }
 0x123   : > { %1341 = vmatprep.mubr.f32.mxu1 %v1288_v2  ;;  %v838_v2 = vld [vmem:[%s1834_s5 + $0x50] sm:$0xff] }
 0x126   : > { %v1292_v6 = vpop.f32.mrb[12].mxu0  ;;  %1342 = vmatmul.mubr.f32.gmra.mrb[10].mxu1 %v1289_v4 }
 0x127   : > { %v601_v7 = vpop.f32.mrb[13].mxu0 }
 0x128   : > { %v1293_v8 = vpop.f32.mrb[14].mxu0  ;;  %1344 = vmatprep.mubr.f32.mxu1 %v601_v7 }
 0x129   : > { %v604_v9 = vpop.f32.mrb[15].mxu0 }
 0x12a   : > { %1345 = vmatmul.mubr.f32.gmra.mrb[12].mxu1 %v604_v9  ;;  %v841_v9 = vld [vmem:[%s1834_s5 + $0x68] sm:$0xff] }
 0x12b   : > { %1347 = vmatprep.mubr.f32.mxu1 %v1292_v6 }
 0x12e   : > { %1348 = vmatmul.mubr.f32.gmra.mrb[14].mxu1 %v1293_v8 }
 0x1e5   : > { %v1328_v16 = vpop.f32.mrb[0].mxu1 }
 0x1e6   : > { %v941_v18 = vmul.f32 %v1328_v16, %v868_v13  ;;  %v749_v19 = vpop.f32.mrb[1].mxu1 }
 0x1e7   : > { %v940_v21 = vmul.f32 %v863_v11, %v749_v19  ;;  %v933_v19 = vpop.permute.xlu0 %932 }
 0x1e8   : > { %v957_v22 = vadd.f32 %v941_v18, %v829_v17  ;;  %v843_v18 = vld [vmem:[%s1834_s5 + $0x78] sm:$0xff] }
 0x1e9   : > { %v956_v24 = vadd.f32 %v940_v21, %v828_v20  ;;  %v1331_v25 = vpop.f32.mrb[2].mxu1 }
 0x1ea   : > { %973 = vst [vmem:[%s1834_s5 + $0x8] sm:$0xff] %v957_v22  ;;  %v943_v28 = vmul.f32 %v1331_v25, %v878_v12  ;;  %v759_v29 = vpop.f32.mrb[3].mxu1  ;;  %v840_v12 = vld [vmem:[%s1834_s5 + $0x60] sm:$0xff]  ;;  %v842_v22 = vld [vmem:[%s1834_s5 + $0x70] sm:$0xff] }
 0x1eb   : > { %972 = vst [vmem:[%s1834_s5] sm:$0xff] %v956_v24  ;;  %v942_v31 = vmul.f32 %v873_v10, %v759_v29 }
 0x1ec   : > { %v959_v32 = vadd.f32 %v943_v28, %v831_v26 }
 0x1ed   : > { %v958_v33 = vadd.f32 %v942_v31, %v830_v30  ;;  %v1334_v34 = vpop.f32.mrb[4].mxu1 }
 0x1ee   : > { %975 = vst [vmem:[%s1834_s5 + $0x18] sm:$0xff] %v959_v32  ;;  %v945_v36 = vmul.f32 %v1334_v34, %v888_v14  ;;  %v769_v37 = vpop.f32.mrb[5].mxu1 }
 0x1ef   : > { %974 = vst [vmem:[%s1834_s5 + $0x10] sm:$0xff] %v958_v33  ;;  %v944_v40 = vmul.f32 %v883_v15, %v769_v37  ;;  %v938_v15 = vpop.permute.xlu1 %937 }
 0x1f0   : > { %v961_v42 = vadd.f32 %v945_v36, %v833_v35 }
 0x1f1   : > { %v960_v43 = vadd.f32 %v944_v40, %v832_v38  ;;  %v1337_v44 = vpop.f32.mrb[6].mxu1  ;;  %v994_v28 = vld [vmem:[%s1834_s5 + $0x8] sm:$0xff] (%p988_p6) }
 0x1f2   : > { %977 = vst [vmem:[%s1834_s5 + $0x28] sm:$0xff] %v961_v42  ;;  %v947_v46 = vmul.f32 %v1337_v44, %v898_v23  ;;  %v779_v47 = vpop.f32.mrb[7].mxu1  ;;  %v993_v26 = vld [vmem:[%s1834_s5] sm:$0xff] (%p988_p6) }
 0x1f3   : > { %976 = vst [vmem:[%s1834_s5 + $0x20] sm:$0xff] %v960_v43  ;;  %v946_v49 = vmul.f32 %v893_v27, %v779_v47  ;;  %v1203_v27 = vld [vmem:[%s1833_s4] ss:$0 sm:$0xff] (%p988_p6) }
 0x1f4   : > { %v963_v50 = vadd.f32 %v947_v46, %v835_v45  ;;  %v1016_v29 = vadd.f32 (%p988_p6), %v1203_v27, %v993_v26  ;;  %v1017_v30 = vadd.f32 (%p988_p6), %v1203_v27, %v994_v28 }
 0x1f5   : > { %v962_v52 = vadd.f32 %v946_v49, %v834_v48  ;;  %v1340_v53 = vpop.f32.mrb[8].mxu1  ;;  %v996_v32 = vld [vmem:[%s1834_s5 + $0x18] sm:$0xff] (%p988_p6) }
 0x1f6   : > { %979 = vst [vmem:[%s1834_s5 + $0x38] sm:$0xff] %v963_v50  ;;  %v949_v56 = vmul.f32 %v1340_v53, %v908_v39  ;;  %v789_v57 = vpop.f32.mrb[9].mxu1  ;;  %v995_v31 = vld [vmem:[%s1834_s5 + $0x10] sm:$0xff] (%p988_p6)  ;;  %v1019_v35 = vadd.f32 (%p988_p6), %v1203_v27, %v996_v32  ;;  %v1032_v40 = vmax.f32 (%p988_p6), %v1016_v29, 0.0 }
 0x1f7   : > { %978 = vst [vmem:[%s1834_s5 + $0x30] sm:$0xff] %v962_v52  ;;  %v948_v59 = vmul.f32 %v903_v41, %v789_v57  ;;  %v1018_v34 = vadd.f32 (%p988_p6), %v1203_v27, %v995_v31  ;;  %v1033_v41 = vmax.f32 (%p988_p6), %v1017_v30, 0.0 }
 0x1f8   : > { %v965_v60 = vadd.f32 %v949_v56, %v837_v54  ;;  %v1035_v48 = vmax.f32 (%p988_p6), %v1019_v35, 0.0  ;;  %1048 = vst [vmem:[%s1834_s5] sm:$0xff] (%p988_p6), %v1032_v40 }
 0x1f9   : > { %v964_v61 = vadd.f32 %v948_v59, %v836_v58  ;;  %v1343_v62 = vpop.f32.mrb[10].mxu1  ;;  %v998_v37 = vld [vmem:[%s1834_s5 + $0x28] sm:$0xff] (%p988_p6)  ;;  %v1034_v47 = vmax.f32 (%p988_p6), %v1018_v34, 0.0  ;;  %1049 = vst [vmem:[%s1834_s5 + $0x8] sm:$0xff] (%p988_p6), %v1033_v41 }
 0x1fa   : > { %981 = vst [vmem:[%s1834_s5 + $0x48] sm:$0xff] %v965_v60  ;;  %v951_v0 = vmul.f32 %v1343_v62, %v918_v51  ;;  %v799_v1 = vpop.f32.mrb[11].mxu1  ;;  %v997_v33 = vld [vmem:[%s1834_s5 + $0x20] sm:$0xff] (%p988_p6)  ;;  %v1021_v42 = vadd.f32 (%p988_p6), %v1203_v27, %v998_v37  ;;  %1051 = vst [vmem:[%s1834_s5 + $0x18] sm:$0xff] (%p988_p6), %v1035_v48 }
 0x1fb   : > { %980 = vst [vmem:[%s1834_s5 + $0x40] sm:$0xff] %v964_v61  ;;  %v950_v4 = vmul.f32 %v913_v55, %v799_v1  ;;  %v1020_v36 = vadd.f32 (%p988_p6), %v1203_v27, %v997_v33  ;;  %1050 = vst [vmem:[%s1834_s5 + $0x10] sm:$0xff] (%p988_p6), %v1034_v47 }
 0x1fc   : > { %v967_v6 = vadd.f32 %v951_v0, %v839_v63  ;;  %v1037_v54 = vmax.f32 (%p988_p6), %v1021_v42, 0.0 }
 0x1fd   : > { %v966_v7 = vadd.f32 %v950_v4, %v838_v2  ;;  %v1346_v8 = vpop.f32.mrb[12].mxu1  ;;  %v1000_v39 = vld [vmem:[%s1834_s5 + $0x38] sm:$0xff] (%p988_p6)  ;;  %v1036_v49 = vmax.f32 (%p988_p6), %v1020_v36, 0.0 }
 0x1fe   : > { %983 = vst [vmem:[%s1834_s5 + $0x58] sm:$0xff] %v967_v6  ;;  %v953_v10 = vmul.f32 %v1346_v8, %v928_v3  ;;  %v809_v11 = vpop.f32.mrb[13].mxu1  ;;  %v999_v38 = vld [vmem:[%s1834_s5 + $0x30] sm:$0xff] (%p988_p6)  ;;  %v1023_v50 = vadd.f32 (%p988_p6), %v1203_v27, %v1000_v39  ;;  %1053 = vst [vmem:[%s1834_s5 + $0x28] sm:$0xff] (%p988_p6), %v1037_v54 }
 0x1ff   : > { %982 = vst [vmem:[%s1834_s5 + $0x50] sm:$0xff] %v966_v7  ;;  %v952_v13 = vmul.f32 %v923_v5, %v809_v11  ;;  %v1022_v43 = vadd.f32 (%p988_p6), %v1203_v27, %v999_v38  ;;  %1052 = vst [vmem:[%s1834_s5 + $0x20] sm:$0xff] (%p988_p6), %v1036_v49 }
 0x200   : > { %v969_v14 = vadd.f32 %v953_v10, %v841_v9  ;;  %v1039_v60 = vmax.f32 (%p988_p6), %v1023_v50, 0.0 }
 0x201   : > { %v968_v16 = vadd.f32 %v952_v13, %v840_v12  ;;  %v1349_v17 = vpop.f32.mrb[14].mxu1  ;;  %992 = sbr.rel (!%p988_p6) target bundleno = 532 (0x214), region = 56  ;;  %v1002_v45 = vld [vmem:[%s1834_s5 + $0x48] sm:$0xff] (%p988_p6)  ;;  %v1038_v55 = vmax.f32 (%p988_p6), %v1022_v43, 0.0 }
 0x202   : > { %985 = vst [vmem:[%s1834_s5 + $0x68] sm:$0xff] %v969_v14  ;;  %v955_v20 = vmul.f32 %v1349_v17, %v938_v15  ;;  %v819_v21 = vpop.f32.mrb[15].mxu1  ;;  %v1001_v44 = vld [vmem:[%s1834_s5 + $0x40] sm:$0xff] (%p988_p6)  ;;  %v1025_v57 = vadd.f32 (%p988_p6), %v1203_v27, %v1002_v45  ;;  %1055 = vst [vmem:[%s1834_s5 + $0x38] sm:$0xff] (%p988_p6), %v1039_v60 }
 0x203   : > { %984 = vst [vmem:[%s1834_s5 + $0x60] sm:$0xff] %v968_v16  ;;  %v954_v23 = vmul.f32 %v933_v19, %v819_v21  ;;  %v1024_v56 = vadd.f32 (%p988_p6), %v1203_v27, %v1001_v44  ;;  %1054 = vst [vmem:[%s1834_s5 + $0x30] sm:$0xff] (%p988_p6), %v1038_v55 }
 0x204   : > { %v971_v24 = vadd.f32 %v955_v20, %v843_v18  ;;  %v1041_v1 = vmax.f32 (%p988_p6), %v1025_v57, 0.0 }
 0x205   : > { %v970_v25 = vadd.f32 %v954_v23, %v842_v22  ;;  %v1004_v51 = vld [vmem:[%s1834_s5 + $0x58] sm:$0xff] (%p988_p6)  ;;  %v1040_v0 = vmax.f32 (%p988_p6), %v1024_v56, 0.0 }
 0x206   : > { %987 = vst [vmem:[%s1834_s5 + $0x78] sm:$0xff] %v971_v24  ;;  %v1003_v46 = vld [vmem:[%s1834_s5 + $0x50] sm:$0xff] (%p988_p6)  ;;  %v1027_v62 = vadd.f32 (%p988_p6), %v1203_v27, %v1004_v51  ;;  %1057 = vst [vmem:[%s1834_s5 + $0x48] sm:$0xff] (%p988_p6), %v1041_v1 }
 0x207   : > { %986 = vst [vmem:[%s1834_s5 + $0x70] sm:$0xff] %v970_v25  ;;  %v1026_v61 = vadd.f32 (%p988_p6), %v1203_v27, %v1003_v46  ;;  %1056 = vst [vmem:[%s1834_s5 + $0x40] sm:$0xff] (%p988_p6), %v1040_v0 }
 0x208   : > { %v1043_v5 = vmax.f32 %v1027_v62, 0.0 }
 0x209   : > { %v1006_v53 = vld [vmem:[%s1834_s5 + $0x68] sm:$0xff]  ;;  %v1042_v4 = vmax.f32 %v1026_v61, 0.0 }
 0x20a   : > { %v1005_v52 = vld [vmem:[%s1834_s5 + $0x60] sm:$0xff]  ;;  %v1029_v2 = vadd.f32 %v1203_v27, %v1006_v53  ;;  %1059 = vst [vmem:[%s1834_s5 + $0x58] sm:$0xff] %v1043_v5 }
 0x20b   : > { %v1028_v63 = vadd.f32 %v1203_v27, %v1005_v52  ;;  %1058 = vst [vmem:[%s1834_s5 + $0x50] sm:$0xff] %v1042_v4 }
 0x20c   : > { %v1045_v8 = vmax.f32 %v1029_v2, 0.0 }
 0x20d   : > { %v1008_v59 = vld [vmem:[%s1834_s5 + $0x78] sm:$0xff]  ;;  %v1044_v6 = vmax.f32 %v1028_v63, 0.0 }
 0x20e   : > { %v1007_v58 = vld [vmem:[%s1834_s5 + $0x70] sm:$0xff]  ;;  %v1031_v7 = vadd.f32 %v1203_v27, %v1008_v59  ;;  %1061 = vst [vmem:[%s1834_s5 + $0x68] sm:$0xff] %v1045_v8 }
 0x20f   : > { %v1030_v3 = vadd.f32 %v1203_v27, %v1007_v58  ;;  %1060 = vst [vmem:[%s1834_s5 + $0x60] sm:$0xff] %v1044_v6 }
 0x210   : > { %v1047_v10 = vmax.f32 %v1031_v7, 0.0 }
 0x211   : > { %v1046_v9 = vmax.f32 %v1030_v3, 0.0 }
 0x212   : > { %1063 = vst [vmem:[%s1834_s5 + $0x78] sm:$0xff] %v1047_v10 }
 0x213   : > { %1062 = vst [vmem:[%s1834_s5 + $0x70] sm:$0xff] %v1046_v9 }
 0x214 PF: > { %s15_s20 = sadd.s32 1, %s1448_s20   ;;  %s1835_s18 = smov %s1444_s19 }
 0x215   : > { %p12_p7 = scmp.ge.s32.totalorder %s15_s20, 5   ;;  %s1836_s19 = smov %s1838_s21 }
 0x217   :  { %14 = sbr.rel (!%p12_p7) target bundleno = 2 (0x2), region = 93 }

</bundles_post_ra>
